<compile_context>
chip_gen: v7x
topology: tpu7x:2x2x1
jax: 0.10.0
libtpu: 0.0.40
codegen_flags: <defaults>
</compile_context>

<pallas_src>
import functools

import jax
import jax.numpy as jnp
import numpy as np
from jax.experimental import pallas as pl
from jax.experimental.pallas import tpu as pltpu

_LANE = 128
_SUBLANE = 8


def _round_up(x, m):
    return ((x + m - 1) // m) * m


def _cdiv(a, b):
    return -(-a // b)


# ----------------------------- Pallas kernels --------------------------------
def _fused_kernel(x_ref, m_ref, b_ref, o_ref, *, softmax):
    # logits = x @ (A_hat.T @ W.T) + b     (single MXU pass, f32 accumulation)
    logits = jnp.dot(x_ref[...], m_ref[...],
                     preferred_element_type=jnp.float32) + b_ref[...]
    if softmax:
        # padded classes carry a -inf bias -> exp == 0, excluded from the sum
        mx = jnp.max(logits, axis=1, keepdims=True)
        e = jnp.exp(logits - mx)
        denom = jnp.sum(e, axis=1, keepdims=True)
        # reciprocal on the EUP slot instead of a VPU divide sequence
        o_ref[...] = (e * pl.reciprocal(denom, approx=True)).astype(o_ref.dtype)
    else:
        o_ref[...] = logits.astype(o_ref.dtype)


def _fused_kernel_ktiled(x_ref, m_ref, b_ref, o_ref, acc_ref, *, softmax):
    # reduction over the (padded) feature axis with an f32 VMEM accumulator
    k = pl.program_id(1)

    @pl.when(k == 0)
    def _():
        acc_ref[...] = jnp.zeros_like(acc_ref)

    acc_ref[...] += jnp.dot(x_ref[...], m_ref[...],
                            preferred_element_type=jnp.float32)

    @pl.when(k == pl.num_programs(1) - 1)
    def _():
        logits = acc_ref[...] + b_ref[...]
        if softmax:
            mx = jnp.max(logits, axis=1, keepdims=True)
            e = jnp.exp(logits - mx)
            denom = jnp.sum(e, axis=1, keepdims=True)
            o_ref[...] = (e * pl.reciprocal(denom, approx=True)).astype(o_ref.dtype)
        else:
            o_ref[...] = logits.astype(o_ref.dtype)


# ------------------------------- module factory -------------------------------
def make_diffuse_lr(a_hat, fc_weight, fc_bias, *, softmax=True,
                    compute_dtype=jnp.bfloat16, out_dtype=jnp.float32,
                    block_b=512, block_k=512,
                    k_tiling_threshold_bytes=16 << 20, force_k_tiling=False):
    """Build a jitted DiffuseLR forward.

    a_hat:     (F, F) dense gcn-normalized adjacency (static).
    fc_weight: (C, F) PyTorch nn.Linear layout (static).
    fc_bias:   (C,)   (static).

    The O(F^2*C) fusion M = A_hat.T @ W.T and all padding are done HERE, once;
    the returned forward only pads x and launches the Pallas kernel.
    """
    F = int(a_hat.shape[0])
    C = int(fc_weight.shape[0])
    assert fc_weight.shape == (C, F) and fc_bias.shape == (C,)

    c_itemsize = jnp.dtype(compute_dtype).itemsize
    o_itemsize = jnp.dtype(out_dtype).itemsize

    # lane-dense class dim; multiple of 256 when large to fill the v6e/v7x MXU
    Cp = _round_up(C, 256 if C > _LANE else _LANE)

    # Fuse diffusion + FC in f32, pad, then cast once to the compute dtype.
    m = jnp.asarray(a_hat, jnp.float32).T @ jnp.asarray(fc_weight, jnp.float32).T
    if Cp != C:
        m = jnp.pad(m, ((0, 0), (0, Cp - C)))
    pad_val = float("-inf") if softmax else 0.0        # -inf -> exp() == 0
    b2d = jnp.pad(jnp.asarray(fc_bias, jnp.float32).reshape(1, C),
                  ((0, 0), (0, Cp - C)), constant_values=pad_val)

    # Resident fused weight vs K-tiled reduction over F.
    assert block_k % _LANE == 0
    weight_bytes = F * Cp * c_itemsize
    use_k_tiling = force_k_tiling or (F > block_k and
                                      weight_bytes > k_tiling_threshold_bytes)
    if use_k_tiling:
        tk = min(block_k, _round_up(F, _LANE))
        Fp = _round_up(F, tk)
    else:
        tk = None
        Fp = F
    if Fp != F:
        m = jnp.pad(m, ((0, Fp - F), (0, 0)))          # zero rows: no contribution
    m = m.astype(compute_dtype)

    def _row_tiling(B):
        if B > block_b:
            bm = block_b
        elif B >= 2 * _SUBLANE:
            # at least 2 row tiles so both v7x TensorCores get work
            # (1-TC chips just see two cheap grid steps)
            bm = _round_up(_cdiv(B, 2), _SUBLANE)
        else:
            bm = B
        # NOTE: padded rows are junk and sliced off; pick B divisible by bm to
        # avoid the wasted compute when it matters.
        return bm, _round_up(B, bm)

    def forward(x):
        B, F_in = x.shape
        assert F_in == F, f"expected {F} features, got {F_in}"
        bm, Bp = _row_tiling(B)

        xk = x.astype(compute_dtype)
        if Bp != B or Fp != F:
            xk = jnp.pad(xk, ((0, Bp - B), (0, Fp - F)))

        cost = pl.CostEstimate(
            flops=2 * Bp * Fp * Cp,
            transcendentals=Bp * Cp if softmax else 0,
            bytes_accessed=(Bp * Fp + Fp * Cp) * c_itemsize + Cp * 4
                           + Bp * Cp * o_itemsize)

        if not use_k_tiling:
            # x/out double-buffered; resident weight + bias single-buffered
            need = (2 * bm * Fp * c_itemsize + Fp * Cp * c_itemsize
                    + 2 * Cp * 4 + 2 * bm * Cp * o_itemsize + bm * Cp * 4)
            vmem_limit = int(min(max(2 * need + (1 << 20), 16 << 20), 64 << 20))
            out = pl.pallas_call(
                functools.partial(_fused_kernel, softmax=softmax),
                out_shape=jax.ShapeDtypeStruct((Bp, Cp), out_dtype),
                grid=(Bp // bm,),
                in_specs=[
                    pl.BlockSpec((bm, Fp), lambda i: (i, 0)),          # x rows
                    pl.BlockSpec((Fp, Cp), lambda i: (0, 0),           # fused weight
                                 pipeline_mode=pl.Buffered(1)),        # (invariant)
                    pl.BlockSpec((1, Cp), lambda i: (0, 0),            # bias
                                 pipeline_mode=pl.Buffered(1)),
                ],
                out_specs=pl.BlockSpec((bm, Cp), lambda i: (i, 0)),
                compiler_params=pltpu.CompilerParams(
                    dimension_semantics=("parallel",),
                    vmem_limit_bytes=vmem_limit),
                cost_estimate=cost,
            )(xk, m, b2d)
        else:
            need = (2 * bm * tk * c_itemsize + 2 * tk * Cp * c_itemsize
                    + 2 * Cp * 4 + 2 * bm * Cp * o_itemsize + bm * Cp * 4)
            vmem_limit = int(min(max(2 * need + (1 << 20), 16 << 20), 64 << 20))
            out = pl.pallas_call(
                functools.partial(_fused_kernel_ktiled, softmax=softmax),
                out_shape=jax.ShapeDtypeStruct((Bp, Cp), out_dtype),
                grid=(Bp // bm, Fp // tk),
                in_specs=[
                    pl.BlockSpec((bm, tk), lambda i, k: (i, k)),
                    pl.BlockSpec((tk, Cp), lambda i, k: (k, 0)),
                    pl.BlockSpec((1, Cp), lambda i, k: (0, 0),
                                 pipeline_mode=pl.Buffered(1)),
                ],
                out_specs=pl.BlockSpec((bm, Cp), lambda i, k: (i, 0)),
                scratch_shapes=[pltpu.VMEM((bm, Cp), jnp.float32)],
                compiler_params=pltpu.CompilerParams(
                    dimension_semantics=("parallel", "arbitrary"),
                    vmem_limit_bytes=vmem_limit),
                cost_estimate=cost,
            )(xk, m, b2d)

        return out[:B, :C]

    return jax.jit(forward)


# --------------------------- parameter / graph setup --------------------------
def build_normalized_adjacency(edge_index, edge_weight, num_nodes):
    """Dense gcn_norm(A) with self-loops, matching torch_geometric's SGConv:
       A_hat[col, row] = deg^-1/2[col] * w * deg^-1/2[row], deg scattered onto col.
    """
    row = np.asarray(edge_index[0])
    col = np.asarray(edge_index[1])
    w = np.asarray(edge_weight, dtype=np.float32)
    a = np.zeros((num_nodes, num_nodes), dtype=np.float32)
    np.add.at(a, (col, row), w)                                  # A_raw[target, source]
    a[np.arange(num_nodes), np.arange(num_nodes)] += 1.0         # self loops
    deg = a.sum(axis=1)
    d_inv_sqrt = np.where(deg > 0, deg ** -0.5, 0.0).astype(np.float32)
    a_hat = d_inv_sqrt[:, None] * a * d_inv_sqrt[None, :]
    return jnp.asarray(a_hat)


def make_chain_graph(num_nodes):
    src = np.concatenate([np.arange(num_nodes - 1), np.arange(1, num_nodes)])
    dst = np.concatenate([np.arange(1, num_nodes), np.arange(num_nodes - 1)])
    edge_index = np.stack([src, dst], axis=0)                    # (2, n_edge)
    edge_weight = np.ones(edge_index.shape[1], dtype=np.float32)
    return edge_index, edge_weight


def reference_forward(x, a_hat, fc_weight, fc_bias, softmax=True):
    xp = x @ a_hat.T
    out = xp @ fc_weight.T + fc_bias
    if softmax:
        out = jax.nn.softmax(out, axis=1)
    return out


# ------------------------------------ main ------------------------------------
if __name__ == "__main__":
    # SGConv.lin.weight is fixed to ones(1), bias=False -> identity; folded into
    # the dense fused matrix M.  Dropout(p=0) is a no-op in this configuration.
    # TODO(synk): non-zero dropout (training mode) not implemented in-kernel.
    batch_size = 8
    nb_feat = 16          # number of features == number of graph nodes
    nb_classes = 4

    key = jax.random.PRNGKey(0)
    kx, kw, kb, kx2, kw2, kb2 = jax.random.split(key, 6)

    x = jax.random.normal(kx, (batch_size, nb_feat), dtype=jnp.float32)
    edge_index, edge_weight = make_chain_graph(nb_feat)
    a_hat = build_normalized_adjacency(edge_index, edge_weight, nb_feat)

    bound = 1.0 / np.sqrt(nb_feat)
    fc_weight = jax.random.uniform(kw, (nb_classes, nb_feat),
                                   minval=-bound, maxval=bound, dtype=jnp.float32)
    fc_bias = jax.random.uniform(kb, (nb_classes,),
                                 minval=-bound, maxval=bound, dtype=jnp.float32)

    ref_sm = reference_forward(x, a_hat, fc_weight, fc_bias, softmax=True)
    ref_lg = reference_forward(x, a_hat, fc_weight, fc_bias, softmax=False)

    # 1) exact-path check (f32 compute) -- kernel structure correctness
    fwd_f32 = make_diffuse_lr(a_hat, fc_weight, fc_bias, softmax=True,
                              compute_dtype=jnp.float32)
    out = jax.block_until_ready(fwd_f32(x))
    np.testing.assert_allclose(np.asarray(out), np.asarray(ref_sm),
                               rtol=2e-3, atol=2e-3)

    # 2) default fast path (bf16 compute, f32 accumulation) -- looser tolerance
    fwd_bf16 = make_diffuse_lr(a_hat, fc_weight, fc_bias, softmax=True)
    out_bf = jax.block_until_ready(fwd_bf16(x))
    np.testing.assert_allclose(np.asarray(out_bf), np.asarray(ref_sm),
                               rtol=5e-2, atol=3e-2)

    # 3) logits path (no softmax), f32
    fwd_lg = make_diffuse_lr(a_hat, fc_weight, fc_bias, softmax=False,
                             compute_dtype=jnp.float32)
    out_lg = jax.block_until_ready(fwd_lg(x))
    np.testing.assert_allclose(np.asarray(out_lg), np.asarray(ref_lg),
                               rtol=1e-4, atol=1e-5)

    # 4) bigger graph: 2 parallel row tiles (both v7x cores busy) + forced
    #    K-tiled accumulator path (grid over F, softmax in the finalize step)
    nb_feat2, batch2 = 256, 48
    x2 = jax.random.normal(kx2, (batch2, nb_feat2), dtype=jnp.float32)
    ei2, ew2 = make_chain_graph(nb_feat2)
    a_hat2 = build_normalized_adjacency(ei2, ew2, nb_feat2)
    bound2 = 1.0 / np.sqrt(nb_feat2)
    w2 = jax.random.uniform(kw2, (nb_classes, nb_feat2),
                            minval=-bound2, maxval=bound2, dtype=jnp.float32)
    b2 = jax.random.uniform(kb2, (nb_classes,),
                            minval=-bound2, maxval=bound2, dtype=jnp.float32)
    fwd_big = make_diffuse_lr(a_hat2, w2, b2, softmax=True,
                              compute_dtype=jnp.float32,
                              block_k=128, force_k_tiling=True)
    out_big = jax.block_until_ready(fwd_big(x2))
    ref_big = reference_forward(x2, a_hat2, w2, b2, softmax=True)
    np.testing.assert_allclose(np.asarray(out_big), np.asarray(ref_big),
                               rtol=2e-3, atol=2e-3)

    print("KERNEL_OK")
</pallas_src>

<mosaic_0001>
module attributes {stable_mosaic.version = 11 : i64} {
  func.func @_fused_kernel(%arg0: i32, %arg1: memref<8x16xf32, #tpu.memory_space<vmem>>, %arg2: memref<16x128xf32, #tpu.memory_space<vmem>>, %arg3: memref<1x128xf32, #tpu.memory_space<vmem>>, %arg4: memref<8x128xf32, #tpu.memory_space<vmem>>) attributes {dimension_semantics = [#tpu.dimension_semantics<parallel>], iteration_bounds = array<i64: 1>, scalar_prefetch = 0 : i64, scratch_operands = 0 : i64, tpu.core_type = #tpu.core_type<tc>, window_params = [{transform_indices = @transform_0, window_bounds = array<i64: 8, 16>}, {pipeline_mode = #tpu.pipeline_mode<synchronous>, transform_indices = @transform_1, window_bounds = array<i64: 16, 128>}, {pipeline_mode = #tpu.pipeline_mode<synchronous>, transform_indices = @transform_2, window_bounds = array<i64: 1, 128>}, {transform_indices = @transform_3, window_bounds = array<i64: 8, 128>}]} {
    %c0 = arith.constant 0 : index
    %c0_0 = arith.constant 0 : index
    %0 = vector.load %arg1[%c0, %c0_0] : memref<8x16xf32, #tpu.memory_space<vmem>>, vector<8x16xf32>
    %c0_1 = arith.constant 0 : index
    %c0_2 = arith.constant 0 : index
    %1 = vector.load %arg2[%c0_1, %c0_2] : memref<16x128xf32, #tpu.memory_space<vmem>>, vector<16x128xf32>
    %cst = arith.constant dense<0.000000e+00> : vector<8x128xf32>
    %2 = tpu.matmul %0, %1, %cst {dimension_numbers = #tpu.dot_dimension_numbers<[1], [0], [0], [1], [0, 0, 1, 1], [], []>} : vector<8x16xf32>, vector<16x128xf32>, vector<8x128xf32> -> vector<8x128xf32>
    %c0_3 = arith.constant 0 : index
    %c0_4 = arith.constant 0 : index
    %3 = vector.load %arg3[%c0_3, %c0_4] : memref<1x128xf32, #tpu.memory_space<vmem>>, vector<1x128xf32>
    %4 = vector.broadcast %3 : vector<1x128xf32> to vector<8x128xf32>
    %5 = arith.addf %2, %4 : vector<8x128xf32>
    %cst_5 = arith.constant dense<0xFF800000> : vector<8xf32>
    %6 = vector.multi_reduction <maximumf>, %5, %cst_5 [1] : vector<8x128xf32> to vector<8xf32>
    %7 = vector.shape_cast %6 : vector<8xf32> to vector<8x1xf32>
    %8 = vector.broadcast %7 : vector<8x1xf32> to vector<8x128xf32>
    %9 = arith.subf %5, %8 : vector<8x128xf32>
    %10 = math.exp %9 : vector<8x128xf32>
    %cst_6 = arith.constant dense<0.000000e+00> : vector<8xf32>
    %11 = vector.multi_reduction <add>, %10, %cst_6 [1] : vector<8x128xf32> to vector<8xf32>
    %12 = vector.shape_cast %11 : vector<8xf32> to vector<8x1xf32>
    %13 = tpu.reciprocal %12 {approx = true} : vector<8x1xf32> -> vector<8x1xf32>
    %14 = vector.broadcast %13 : vector<8x1xf32> to vector<8x128xf32>
    %15 = arith.mulf %10, %14 : vector<8x128xf32>
    %c0_7 = arith.constant 0 : index
    %c0_8 = arith.constant 0 : index
    %16 = vector.load %arg4[%c0_7, %c0_8] : memref<8x128xf32, #tpu.memory_space<vmem>>, vector<8x128xf32>
    tpu.vector_store %arg4[%c0_7, %c0_8], %15 {strides = array<i32>} : memref<8x128xf32, #tpu.memory_space<vmem>>, vector<8x128xf32>,
    return
  }
  func.func @transform_0(%arg0: i32) -> (i32, i32) {
    %c0_i32 = arith.constant 0 : i32
    %c0_i32_0 = arith.constant 0 : i32
    return %arg0, %c0_i32 : i32, i32
  }
  func.func @transform_1(%arg0: i32) -> (i32, i32) {
    %c0_i32 = arith.constant 0 : i32
    %c0_i32_0 = arith.constant 0 : i32
    %c0_i32_1 = arith.constant 0 : i32
    return %c0_i32, %c0_i32_0 : i32, i32
  }
  func.func @transform_2(%arg0: i32) -> (i32, i32) {
    %c0_i32 = arith.constant 0 : i32
    %c0_i32_0 = arith.constant 0 : i32
    %c0_i32_1 = arith.constant 0 : i32
    return %c0_i32, %c0_i32_0 : i32, i32
  }
  func.func @transform_3(%arg0: i32) -> (i32, i32) {
    %c0_i32 = arith.constant 0 : i32
    %c0_i32_0 = arith.constant 0 : i32
    return %arg0, %c0_i32 : i32, i32
  }
}

</mosaic_0001>

<bundles_post_ra>
// kernel: forward.1
= control target key start
LH: loop header
LB: loop body
LE: loop exit
PB: predicated region body
PF: predicated region fallthrough
CT: control target
= control target key end

     0   :  { %8 = vsyncpa [#allocation3], 0  ;;  %s278_s0 = inlined_call_operand.hbm [shape: f32[8,16], index: 0, kind: input, shape index: {}]   ;;  %s279_s1 = inlined_call_operand.hbm [shape: f32[16,128], index: 1, kind: input, shape index: {}]   ;;  %s280_s2 = inlined_call_operand.vmem [shape: f32[1,128], index: 2, kind: input, shape index: {}]   ;;  %s281_s3 = inlined_call_operand.vmem [shape: f32[8,128], index: 3, kind: output, shape index: {}]  }
   0x1   :  { %9 = vsyncpa [#allocation5], 0  ;;  %s214_s12 = smov [#allocation2]   ;;  %s215_s14 = smov [#allocation4]  }
   0x2   :  { %s16_s13 = sshll.u32 %s214_s12, 4  ;;  %s25_s15 = sshll.u32 %s215_s14, 4  ;;  %s17_s13 = int_to_ptr.vmem [resolvable:$true] %s16_s13  ;;  %s241_s15 = int_to_ptr.vmem [resolvable:$true] %s25_s15 }
   0x3   :  { %s166_s18 = scalar_lea.hbm %s278_s0, 128 }
   0x4   :  { %p167_p0 = scmp.ne.s32.totalorder %s278_s0, %s166_s18  ;;  %p170_p1 = scmp.lt.u32.totalorder %s166_s18, %s278_s0 }
   0x6   :  { %p172_p2 = pnand %p170_p1, %p167_p0 }
   0x8   :  { %175 = shalt.err (!%p172_p2)
}
   0x9   :  { %s176_s23 = scalar_lea.vmem %s17_s13, 128  ;;  %p181_p4 = scmp.lt.s32.totalorder %s17_s13, %s17_s13 }
   0xa   :  { %p177_p3 = scmp.ne.s32.totalorder %s17_s13, %s176_s23  ;;  %p182_p5 = scmp.lt.s32.totalorder %s176_s23, %s176_s23 }
   0xc   :  { %p183_p6 = por %p182_p5, %p181_p4 }
   0xe   :  { %p184_p7 = pnand %p183_p6, %p177_p3 }
  0x10   :  { %187 = shalt.err (!%p184_p7)
}
  0x11   :  { %19 = dma.hbm_to_vmem [thread:$0]  %s278_s0, 128, %s17_s13, [#allocation3]  }
  0x12   :  { %s188_s28 = scalar_lea.hbm %s279_s1, 256 }
  0x13   :  { %p189_p8 = scmp.ne.s32.totalorder %s279_s1, %s188_s28  ;;  %p192_p9 = scmp.lt.u32.totalorder %s188_s28, %s279_s1 }
  0x15   :  { %p194_p10 = pnand %p192_p9, %p189_p8 }
  0x17   :  { %197 = shalt.err (!%p194_p10)
}
  0x18   :  { %s198_s6 = scalar_lea.vmem %s241_s15, 256  ;;  %p203_p12 = scmp.lt.s32.totalorder %s241_s15, %s241_s15 }
  0x19   :  { %p199_p11 = scmp.ne.s32.totalorder %s241_s15, %s198_s6  ;;  %p204_p13 = scmp.lt.s32.totalorder %s198_s6, %s198_s6 }
  0x1b   :  { %p205_p0 = por %p204_p13, %p203_p12 }
  0x1d   :  { %p206_p1 = pnand %p205_p0, %p199_p11 }
  0x1f   :  { %209 = shalt.err (!%p206_p1)
}
  0x20   :  { %s216_s0 = smov 128   ;;  %s217_s7 = smov 8  }
  0x21   :  { %31 = dma.hbm_to_vmem [thread:$0]  %s279_s1, 256, %s241_s15, [#allocation5], %s216_s0, %s216_s0, %s217_s7  }
  0x22   :  { %210 = dma.done.wait [#allocation3], 128  }
  0x23   :  { %211 = vsyncadd [#allocation3], 4294967168 }
  0x24   :  { %212 = dma.done.wait [#allocation5], 256  }
  0x25   :  { %213 = vsyncadd [#allocation5], 4294967040  ;;  %v218_v0 = vmov 0.0|0.0   ;;  %vm219_vm0 = vmmov 0   ;;  %v220_v1 = vmov 0.0   ;;  %v41_v2 = vld [vmem:[#allocation4] sm:$0xff] }
  0x26   :  { %152 = vmatprep.subr.bf16.mxu0 %v218_v0  ;;  %149 = vmatprep.mubr.msk.f32.mxu0 %vm219_vm0, %v220_v1  ;;  %v42_v3 = vld [vmem:[#allocation4 + $0x8] sm:$0xff]  ;;  %v40_v5 = vld [vmem:[#allocation2] sm:$0xff]  ;;  %vm50_vm1 = vcmask 130048  }
  0x27   :  { %v153_v4 = vpack.c.bf16 %v42_v3, %v41_v2  ;;  %v140_v6 = vld [vmem:[%s280_s2] ss:$0 sm:$0xff] }
  0x29   :  { %154 = vmatpush3.bf16.msra.mxu0 %v153_v4 }
  0x2c   :  { %150 = vmatmul.mubr.msk.f32.vlgmr.msra.gmra.mrb[0].mxu0 %vm50_vm1, %v40_v5 }
  0xff   :  { %v120_v7 = vpop.f32.mrb[0].mxu0 }
 0x100   :  { %v121_v8 = vadd.f32 %v140_v6, %v120_v7  ;;  %v151_v9 = vpop.f32.mrb[1].mxu0 }
 0x102   :  { %124 = vmax.xlane.f32.xlu0 %v121_v8 }
 0x18f   :  { %v125_v10 = vpop.xlane.xlu0 %124 }
 0x190   :  { %v126_v11 = vsub.f32 %v121_v8, %v125_v10 }
 0x192   :  { %v127_v12 = vmul.f32 1.442695, %v126_v11 }
 0x194   :  { %162 = vpow2.f32 %v127_v12 }
 0x19e   :  { %v163_v13 = vpop.eup %162 }
 0x19f   :  { %129 = vadd.xlane.f32.xlu0 %v163_v13 }
 0x22c   :  { %v130_v14 = vpop.xlane.xlu0 %129 }
 0x22d   :  { %164 = vrcp.f32 %v130_v14 }
 0x237   :  { %v165_v15 = vpop.eup %164 }
 0x238   :  { %v132_v16 = vmul.f32 %v165_v15, %v163_v13 }
 0x23a   :  { %133 = vst [vmem:[%s281_s3] sm:$0xff] %v132_v16 }
 0x23b   :  { %138 = vsyncpa [#allocation3], 1 }
 0x23c   :  { %139 = vsyncpa [#allocation5], 1 }

</bundles_post_ra>
